<compile_context>
chip_gen: v7x
topology: tpu7x:2x2x1
jax: 0.10.0
libtpu: 0.0.40
codegen_flags: <defaults>
</compile_context>

<pallas_src>
import functools

import jax
import jax.numpy as jnp
import jax.scipy.special  # explicit, used for the logsumexp combine
from jax.experimental import pallas as pl
from jax.experimental.pallas import tpu as pltpu

_NEG_BIG = -1e30  # finite "minus infinity": exp(_NEG_BIG - finite) == 0 in f32


def _simclr_kernel(scores_ref, row_lse_ref, col_plse_ref, *,
                   inv_temp, n_rows, block_rows, needs_mask, single_exp):
    """One (TM, N) row tile -> per-row LSE (TM, 1) and per-column partial LSE (1, 1, N)."""
    s = scores_ref[...].astype(jnp.float32) * inv_temp            # (TM, N), f32 compute

    if needs_mask:
        # Ragged last tile: rows with global index >= n_rows contain garbage.
        row0 = pl.program_id(0) * block_rows
        row_ids = row0 + jax.lax.broadcasted_iota(jnp.int32, (block_rows, 1), 0)
        s = jnp.where(row_ids < n_rows, s, _NEG_BIG)

    # ---- row-wise logsumexp (each row fully present in the tile). ----
    row_max = jnp.max(s, axis=1, keepdims=True)                   # (TM, 1)
    p = jnp.exp(s - row_max)                                      # (TM, N): the ONLY full-tile exp
    row_lse = row_max + jnp.log(jnp.sum(p, axis=1, keepdims=True))
    row_lse_ref[...] = row_lse                                    # ragged-tail writes are clipped

    # ---- per-column partial logsumexp for this tile. ----
    if single_exp:
        # Reuse p (no second full-tile exp; EUP relief on v7x / bf16-v6e):
        #   sum_i exp(s_ij) = exp(t_g) * sum_i p_ij * exp(row_max_i - t_g)
        # Masked rows contribute p_ij * exp(_NEG_BIG - t_g) == 0.
        t_g = jnp.max(row_max, axis=0, keepdims=True)             # (1, 1) tile global max
        w = jnp.exp(row_max - t_g)                                # (TM, 1), O(TM) EUP work
        col_sum = jnp.sum(p * w, axis=0, keepdims=True)           # (1, N), one extra VPU mul/elt
        col_plse = t_g + jnp.log(col_sum)
    else:
        # Robust fallback: second full-tile exp relative to per-column max.
        col_max = jnp.max(s, axis=0, keepdims=True)               # (1, N)
        col_plse = col_max + jnp.log(
            jnp.sum(jnp.exp(s - col_max), axis=0, keepdims=True))
    col_plse_ref[...] = col_plse.reshape(1, 1, col_plse.shape[-1])


def _vmem_capacity_bytes():
    try:
        return int(pltpu.get_tpu_info().vmem_capacity_bytes)
    except Exception:
        return 64 << 20   # conservative fallback (v7x per-core VMEM)


def _pick_vmem_limit(capacity_bytes):
    # ~64 MiB scoped limit on 128 MiB parts (v5e/v6e), ~44 MiB on v7x (64 MiB).
    if capacity_bytes >= (100 << 20):
        return 64 << 20
    return max(32 << 20, capacity_bytes - (20 << 20))


def _pick_block_rows(n, itemsize, vmem_limit_bytes, max_rows=1024):
    """Largest sublane-aligned row tile whose pipeline working set fits VMEM.

    Accounts for the double-buffered (TM, N) input, ~3 full-tile f32 compute
    temporaries (cast/shift, exp, product) and the small per-tile outputs.
    """
    sub = {4: 8, 2: 16, 1: 32}.get(itemsize, 8)
    fixed = 64 * n * 4 + (2 << 20)                 # outputs + safety margin
    per_row = 2 * n * itemsize + 3 * n * 4         # input (x2 buffers) + f32 temporaries
    budget = max(vmem_limit_bytes - fixed, per_row * sub)
    tm = min(max_rows, budget // per_row, n)
    if tm >= n:
        return n                                    # single full-height tile
    return max(sub, (int(tm) // sub) * sub)


def simclr_loss(scores, temp, *, block_rows=None, single_exp=True):
    """Pallas TPU implementation of simCLRloss(temp).forward(scores)."""
    n = scores.shape[0]
    assert scores.ndim == 2 and scores.shape == (n, n), "scores must be (N, N)"
    itemsize = jnp.dtype(scores.dtype).itemsize
    sub = {4: 8, 2: 16, 1: 32}.get(itemsize, 8)
    inv_temp = 1.0 / float(temp)

    cap = _vmem_capacity_bytes()
    vmem_limit = _pick_vmem_limit(cap)
    if block_rows is None:
        block_rows = _pick_block_rows(n, itemsize, vmem_limit)
    block_rows = min(int(block_rows), n)
    assert block_rows == n or block_rows % sub == 0, (
        f"block_rows={block_rows} must be a multiple of {sub} (or equal N={n}) "
        f"for dtype {scores.dtype}")
    # If block_rows was user-supplied, make sure the limit covers it (capped by HW).
    est = (2 * block_rows * n * itemsize + 3 * block_rows * n * 4
           + 64 * n * 4 + (2 << 20))
    vmem_limit = int(min(max(vmem_limit, est), max(cap - (8 << 20), 32 << 20)))

    num_tiles = int(pl.cdiv(n, block_rows))
    needs_mask = (n % block_rows) != 0

    kernel = functools.partial(
        _simclr_kernel, inv_temp=inv_temp, n_rows=n, block_rows=block_rows,
        needs_mask=needs_mask, single_exp=single_exp)

    cost = pl.CostEstimate(
        flops=6 * n * n,
        transcendentals=(1 if single_exp else 2) * n * n,
        bytes_accessed=n * n * itemsize + (num_tiles * n + n) * 4)

    row_lse, col_plse = pl.pallas_call(
        kernel,
        out_shape=(jax.ShapeDtypeStruct((n, 1), jnp.float32),
                   jax.ShapeDtypeStruct((num_tiles, 1, n), jnp.float32)),
        grid=(num_tiles,),
        in_specs=[pl.BlockSpec((block_rows, n), lambda i: (i, 0))],
        out_specs=(pl.BlockSpec((block_rows, 1), lambda i: (i, 0)),
                   pl.BlockSpec((1, 1, n), lambda i: (i, 0, 0))),
        compiler_params=pltpu.CompilerParams(
            dimension_semantics=("parallel",),      # independent tiles -> both TCs on v7x
            vmem_limit_bytes=vmem_limit),
        cost_estimate=cost,
    )(scores)

    # Tiny O(num_tiles * N) combine in JAX (keeps the kernel grid fully parallel).
    row_sum = jnp.sum(row_lse)
    col_lse = jax.scipy.special.logsumexp(col_plse[:, 0, :], axis=0)   # (N,)
    diag_sum = jnp.sum(jnp.diagonal(scores).astype(jnp.float32)) * inv_temp
    return (row_sum + jnp.sum(col_lse) - 2.0 * diag_sum) / n


def _reference(scores, temp):
    """Pure-JAX reference mirroring the PyTorch simCLRloss module."""
    s = scores.astype(jnp.float32) / float(temp)
    n = s.shape[0]
    idx = jnp.arange(n)
    diag = s[idx, idx]
    lse_row = jax.scipy.special.logsumexp(s, axis=1)
    lse_col = jax.scipy.special.logsumexp(s, axis=0)
    loss0 = jnp.mean(lse_row - diag)   # CE(scores/temp, labels), reduction='mean'
    loss1 = jnp.mean(lse_col - diag)   # CE(scores.T/temp, labels)
    return loss0 + loss1


if __name__ == "__main__":
    key = jax.random.PRNGKey(0)
    k1, k2, k3, k4 = jax.random.split(key, 4)

    # Small case matching the module: batch of N=8 paired embeddings -> (8, 8) scores.
    scores8 = jax.random.normal(k1, (8, 8), dtype=jnp.float32)
    loss = simclr_loss(scores8, 0.1)
    jax.block_until_ready(loss)
    ref = _reference(scores8, 0.1)
    assert jnp.allclose(loss, ref, rtol=1e-5, atol=1e-5), (loss, ref)

    # Multi-tile case (divisible N): exercises the per-tile partials + JAX combine.
    scores256 = jax.random.normal(k2, (256, 256), dtype=jnp.float32) * 3.0
    loss_mt = simclr_loss(scores256, 0.5, block_rows=64)
    jax.block_until_ready(loss_mt)
    ref_mt = _reference(scores256, 0.5)
    assert jnp.allclose(loss_mt, ref_mt, rtol=1e-4, atol=1e-3), (loss_mt, ref_mt)

    # Two-exp fallback path on the same data.
    loss_fb = simclr_loss(scores256, 0.5, block_rows=64, single_exp=False)
    jax.block_until_ready(loss_fb)
    assert jnp.allclose(loss_fb, ref_mt, rtol=1e-4, atol=1e-3), (loss_fb, ref_mt)

    # Ragged N (not divisible by the tile): exercises the in-kernel row masking.
    scores200 = jax.random.normal(k3, (200, 200), dtype=jnp.float32)
    loss_rg = simclr_loss(scores200, 0.3, block_rows=64)
    jax.block_until_ready(loss_rg)
    ref_rg = _reference(scores200, 0.3)
    assert jnp.allclose(loss_rg, ref_rg, rtol=1e-4, atol=1e-3), (loss_rg, ref_rg)

    # bf16 input path (halves HBM traffic; compute stays f32 in-kernel).
    scores_bf16 = jax.random.normal(k4, (128, 128), dtype=jnp.float32).astype(jnp.bfloat16)
    loss_bf = simclr_loss(scores_bf16, 0.2, block_rows=32)
    jax.block_until_ready(loss_bf)
    ref_bf = _reference(scores_bf16, 0.2)
    assert jnp.allclose(loss_bf, ref_bf, rtol=1e-3, atol=1e-3), (loss_bf, ref_bf)

    print("KERNEL_OK")
</pallas_src>

<mosaic_0001>
module attributes {stable_mosaic.version = 11 : i64} {
  func.func @_simclr_kernel(%arg0: i32, %arg1: memref<8x8xf32, #tpu.memory_space<vmem>>, %arg2: memref<8x1xf32, #tpu.memory_space<vmem>>, %arg3: memref<1x1x8xf32, #tpu.memory_space<vmem>>) attributes {dimension_semantics = [#tpu.dimension_semantics<parallel>], iteration_bounds = array<i64: 1>, scalar_prefetch = 0 : i64, scratch_operands = 0 : i64, tpu.core_type = #tpu.core_type<tc>, window_params = [{transform_indices = @transform_0, window_bounds = array<i64: 8, 8>}, {transform_indices = @transform_1, window_bounds = array<i64: 8, 1>}, {transform_indices = @transform_2, window_bounds = array<i64: 1, 1, 8>}]} {
    %c0 = arith.constant 0 : index
    %c0_0 = arith.constant 0 : index
    %0 = vector.load %arg1[%c0, %c0_0] : memref<8x8xf32, #tpu.memory_space<vmem>>, vector<8x8xf32>
    %cst = arith.constant 1.000000e+01 : f32
    %1 = vector.broadcast %cst : f32 to vector<8x8xf32>
    %2 = arith.mulf %0, %1 : vector<8x8xf32>
    %cst_1 = arith.constant dense<0xFF800000> : vector<8xf32>
    %3 = vector.multi_reduction <maximumf>, %2, %cst_1 [1] : vector<8x8xf32> to vector<8xf32>
    %4 = vector.shape_cast %3 : vector<8xf32> to vector<8x1xf32>
    %5 = vector.broadcast %4 : vector<8x1xf32> to vector<8x8xf32>
    %6 = arith.subf %2, %5 : vector<8x8xf32>
    %7 = math.exp %6 : vector<8x8xf32>
    %cst_2 = arith.constant dense<0.000000e+00> : vector<8xf32>
    %8 = vector.multi_reduction <add>, %7, %cst_2 [1] : vector<8x8xf32> to vector<8xf32>
    %9 = vector.shape_cast %8 : vector<8xf32> to vector<8x1xf32>
    %10 = math.log %9 : vector<8x1xf32>
    %11 = arith.addf %4, %10 : vector<8x1xf32>
    %c0_3 = arith.constant 0 : index
    %c0_4 = arith.constant 0 : index
    %12 = vector.load %arg2[%c0_3, %c0_4] : memref<8x1xf32, #tpu.memory_space<vmem>>, vector<8x1xf32>
    tpu.vector_store %arg2[%c0_3, %c0_4], %11 {strides = array<i32>} : memref<8x1xf32, #tpu.memory_space<vmem>>, vector<8x1xf32>,
    %cst_5 = arith.constant dense<0xFF800000> : vector<1xf32>
    %13 = vector.multi_reduction <maximumf>, %4, %cst_5 [0] : vector<8x1xf32> to vector<1xf32>
    %14 = vector.shape_cast %13 : vector<1xf32> to vector<1x1xf32>
    %15 = vector.broadcast %14 : vector<1x1xf32> to vector<8x1xf32>
    %16 = arith.subf %4, %15 : vector<8x1xf32>
    %17 = math.exp %16 : vector<8x1xf32>
    %18 = vector.broadcast %17 : vector<8x1xf32> to vector<8x8xf32>
    %19 = arith.mulf %7, %18 : vector<8x8xf32>
    %cst_6 = arith.constant dense<0.000000e+00> : vector<8xf32>
    %20 = vector.multi_reduction <add>, %19, %cst_6 [0] : vector<8x8xf32> to vector<8xf32>
    %21 = vector.shape_cast %20 : vector<8xf32> to vector<1x8xf32>
    %22 = math.log %21 : vector<1x8xf32>
    %23 = vector.broadcast %14 : vector<1x1xf32> to vector<1x8xf32>
    %24 = arith.addf %23, %22 : vector<1x8xf32>
    %25 = vector.shape_cast %24 : vector<1x8xf32> to vector<1x1x8xf32>
    %c0_7 = arith.constant 0 : index
    %c0_8 = arith.constant 0 : index
    %c0_9 = arith.constant 0 : index
    %26 = vector.load %arg3[%c0_7, %c0_8, %c0_9] : memref<1x1x8xf32, #tpu.memory_space<vmem>>, vector<1x1x8xf32>
    tpu.vector_store %arg3[%c0_7, %c0_8, %c0_9], %25 {strides = array<i32>} : memref<1x1x8xf32, #tpu.memory_space<vmem>>, vector<1x1x8xf32>,
    return
  }
  func.func @transform_0(%arg0: i32) -> (i32, i32) {
    %c0_i32 = arith.constant 0 : i32
    %c0_i32_0 = arith.constant 0 : i32
    return %arg0, %c0_i32 : i32, i32
  }
  func.func @transform_1(%arg0: i32) -> (i32, i32) {
    %c0_i32 = arith.constant 0 : i32
    %c0_i32_0 = arith.constant 0 : i32
    return %arg0, %c0_i32 : i32, i32
  }
  func.func @transform_2(%arg0: i32) -> (i32, i32, i32) {
    %c0_i32 = arith.constant 0 : i32
    %c0_i32_0 = arith.constant 0 : i32
    %c0_i32_1 = arith.constant 0 : i32
    return %arg0, %c0_i32, %c0_i32_0 : i32, i32, i32
  }
}

</mosaic_0001>

<bundles_post_ra>
// kernel: tpu_custom_call.1
= control target key start
LH: loop header
LB: loop body
LE: loop exit
PB: predicated region body
PF: predicated region fallthrough
CT: control target
= control target key end

     0   :  { %8 = vsyncpa [#allocation3], 0  ;;  %s186_s0 = inlined_call_operand.hbm [shape: f32[8,8], index: 0, kind: input, shape index: {}]   ;;  %s187_s1 = inlined_call_operand.vmem [shape: f32[8,1], index: 1, kind: output, shape index: {0}]   ;;  %s188_s2 = inlined_call_operand.hbm [shape: f32[1,1,8], index: 2, kind: output, shape index: {1}]  }
   0x1   :  { %9 = vsyncpa [#allocation4], 0  ;;  %s139_s9 = smov [#allocation2]   ;;  %s91_s13 = scalar_lea.hbm %s186_s0, 128 }
   0x2   :  { %s16_s10 = sshll.u32 %s139_s9, 4  ;;  %p92_p0 = scmp.ne.s32.totalorder %s186_s0, %s91_s13  ;;  %s17_s10 = int_to_ptr.vmem [resolvable:$true] %s16_s10 }
   0x3   :  { %p95_p1 = scmp.lt.u32.totalorder %s91_s13, %s186_s0 }
   0x5   :  { %p97_p2 = pnand %p95_p1, %p92_p0 }
   0x7   :  { %100 = shalt.err (!%p97_p2)
}
   0x8   :  { %s101_s18 = scalar_lea.vmem %s17_s10, 128  ;;  %p106_p4 = scmp.lt.s32.totalorder %s17_s10, %s17_s10 }
   0x9   :  { %p102_p3 = scmp.ne.s32.totalorder %s17_s10, %s101_s18  ;;  %p107_p5 = scmp.lt.s32.totalorder %s101_s18, %s101_s18 }
   0xb   :  { %p108_p6 = por %p107_p5, %p106_p4 }
   0xd   :  { %p109_p7 = pnand %p108_p6, %p102_p3 }
   0xf   :  { %112 = shalt.err (!%p109_p7)
}
  0x10   :  { %19 = dma.hbm_to_vmem [thread:$0]  %s186_s0, 128, %s17_s10, [#allocation3]  }
  0x11   :  { %135 = dma.done.wait [#allocation3], 128  }
  0x12   :  { %136 = vsyncadd [#allocation3], 4294967168  ;;  %v23_v0 = vld [vmem:[#allocation2] sm:$0xff]  ;;  %vm25_vm0 = vcmask 64512   ;;  %s140_s0 = smov [#allocation5]   ;;  %vm60_vm1 = vcmask 57344  }
  0x13   :  { %v24_v1 = vmul.f32 10.0, %v23_v0  ;;  %s70_s21 = sshll.u32 %s140_s0, 4  ;;  %s71_s21 = int_to_ptr.vmem [resolvable:$true] %s70_s21 }
  0x14   :  { %s113_s22 = scalar_lea.vmem %s71_s21, 16  ;;  %s117_s23 = scalar_lea.vmem %s71_s21, 32 }
  0x15   :  { %v26_v2 = vsel %vm25_vm0, %v24_v1, -inf  ;;  %p114_p8 = scmp.ne.s32.totalorder %s71_s21, %s113_s22  ;;  %p118_p9 = scmp.lt.s32.totalorder %s71_s21, %s71_s21 }
  0x16   :  { %27 = vmax.xlane.f32.xlu0 %v26_v2  ;;  %p119_p10 = scmp.lt.s32.totalorder %s117_s23, %s113_s22 }
  0x18   :  { %p120_p11 = por %p119_p10, %p118_p9 }
  0x1a   :  { %p121_p12 = pnand %p120_p11, %p114_p8 }
  0xa3   :  { %v28_v3 = vpop.xlane.xlu0 %27 }
  0xa4   :  { %v29_v4 = vsub.f32 %v24_v1, %v28_v3  ;;  %v40_v5 = vrot.slane %v28_v3, 4 }
  0xa6   :  { %v30_v6 = vmul.f32 1.442695, %v29_v4  ;;  %v41_v7 = vmax.f32 %v28_v3, %v40_v5 }
  0xa8   :  { %83 = vpow2.f32 %v30_v6  ;;  %v42_v8 = vrot.slane %v41_v7, 2 }
  0xaa   :  { %v43_v9 = vmax.f32 %v41_v7, %v42_v8 }
  0xac   :  { %v44_v10 = vrot.slane %v43_v9, 1 }
  0xae   :  { %v45_v11 = vmax.f32 %v43_v9, %v44_v10 }
  0xb0   :  { %v46_v12 = vsub.f32 %v28_v3, %v45_v11 }
  0xb2   :  { %v84_v13 = vpop.eup %83  ;;  %v47_v14 = vmul.f32 1.442695, %v46_v12 }
  0xb3   :  { %v32_v15 = vsel %vm25_vm0, %v84_v13, 0.0 }
  0xb4   :  { %33 = vadd.xlane.f32.xlu0 %v32_v15  ;;  %85 = vpow2.f32 %v47_v14 }
  0xbe   :  { %v86_v16 = vpop.eup %85 }
  0xbf   :  { %v49_v17 = vmul.f32 %v86_v16, %v84_v13 }
  0xc1   :  { %v50_v18 = vsel %vm25_vm0, %v49_v17, 0.0 }
  0xc2   :  { %v51_v19 = vrot.slane %v50_v18, 4 }
  0xc4   :  { %v52_v20 = vadd.f32 %v51_v19, %v50_v18 }
  0xc6   :  { %v53_v21 = vrot.slane %v52_v20, 2 }
  0xc8   :  { %v54_v22 = vadd.f32 %v53_v21, %v52_v20 }
  0xca   :  { %v55_v23 = vrot.slane %v54_v22, 1 }
  0xcc   :  { %v56_v24 = vadd.f32 %v55_v23, %v54_v22 }
  0xce   :  { %87 = vlog2.f32 %v56_v24 }
  0xd8   :  { %v88_v25 = vpop.eup %87 }
  0xd9   :  { %v58_v26 = vmul.f32 0.6931472, %v88_v25 }
  0xdb   :  { %v59_v27 = vadd.f32 %v58_v26, %v45_v11 }
  0xdd   :  { %61 = vst.msk [vmem:[#allocation5] sm:$0x1] %vm60_vm1, %v59_v27 }
  0xde   :  { %124 = shalt.err (!%p121_p12)
}
  0xdf   :  { %s125_s26 = scalar_lea.hbm %s188_s2, 16 }
  0xe0   :  { %p126_p13 = scmp.ne.s32.totalorder %s188_s2, %s125_s26  ;;  %p129_p0 = scmp.lt.u32.totalorder %s125_s26, %s188_s2 }
  0xe2   :  { %p131_p1 = pnand %p129_p0, %p126_p13 }
  0xe4   :  { %134 = shalt.err (!%p131_p1)
}
  0xe5   :  { %73 = dma.vmem_to_hbm [thread:$0]  %s71_s21, 16, %s188_s2, [#allocation4]   ;;  %vm38_vm2 = vcmask 7168  }
 0x141   :  { %v34_v28 = vpop.xlane.xlu0 %33 }
 0x142   :  { %89 = vlog2.f32 %v34_v28 }
 0x14c   :  { %v90_v29 = vpop.eup %89 }
 0x14d   :  { %v36_v30 = vmul.f32 0.6931472, %v90_v29 }
 0x14f   :  { %v37_v31 = vadd.f32 %v36_v30, %v28_v3 }
 0x151   :  { %39 = vst.msk [vmem:[%s187_s1] sm:$0xff] %vm38_vm2, %v37_v31 }
 0x152   :  { %137 = dma.done.wait [#allocation4], 16  }
 0x153   :  { %138 = vsyncadd [#allocation4], 4294967280 }
 0x154   :  { %79 = vsyncpa [#allocation3], 1 }
 0x155   :  { %80 = vsyncpa [#allocation4], 1 }

</bundles_post_ra>
